<compile_context>
chip_gen: v7x
topology: tpu7x:2x2x1
jax: 0.10.0
libtpu: 0.0.40
codegen_flags: <defaults>
</compile_context>

<pallas_src>
import jax
import jax.numpy as jnp
from jax import lax
from jax.experimental import pallas as pl
from jax.experimental.pallas import tpu as pltpu


# --------------------------------------------------------------------------- #
# Hardware-aware sizing helpers
# --------------------------------------------------------------------------- #
def _round_up(x, m):
    return -(-x // m) * m


def _vmem_capacity_bytes():
    """Per-TensorCore VMEM capacity; conservative (v7x) fallback if unknown."""
    try:
        cap = int(pltpu.get_tpu_info().vmem_capacity_bytes)
        if cap >= (32 << 20):
            return cap
    except Exception:
        pass
    return 64 << 20  # v7x per-TC VMEM — safe lower bound on every generation


def _choose_block_rows(n_rows, n_classes, pf_itemsize, tf_itemsize, vmem_cap):
    """Rows per block for the stacked (N, C) feature matrices."""
    # 2 pipeline buffers x (pf + tf) bytes per row x tb <= input_budget.
    # ~24 MiB of in-flight input tiles reaches ~85-90% of HBM roofline while
    # leaving headroom even on v7x's 64 MiB VMEM/TC.
    input_budget = min(24 << 20, vmem_cap // 2)
    per_row_bytes = 2 * n_classes * (pf_itemsize + tf_itemsize)
    tb_budget = max(8, (input_budget // per_row_bytes) // 8 * 8)
    # Guarantee >= 2 grid blocks so the "parallel" grid axis can be sharded
    # across v7x's two TensorCores (harmless on 1-TC v5e/v6e).
    tb_two_blocks = max(8, _round_up(_round_up(n_rows, 2) // 2, 8))
    # TODO(synk): for vocab-scale C (>=128K) add a class-axis grid dimension
    # (online-lse) instead of falling back to 8-row tiles.
    return int(min(tb_budget, tb_two_blocks))


# --------------------------------------------------------------------------- #
# Kernel: per-block soft-target cross-entropy partial sum
# --------------------------------------------------------------------------- #
def _make_ce_kernel(tb, n_valid, needs_mask):
    def kernel(pf_ref, tf_ref, out_ref):
        p = pf_ref[...].astype(jnp.float32)                    # (TB, C)
        t = tf_ref[...].astype(jnp.float32)                    # (TB, C)

        m = jnp.max(p, axis=-1, keepdims=True)                 # (TB, 1)
        lse = jnp.log(jnp.sum(jnp.exp(p - m), axis=-1, keepdims=True)) + m
        sum_t = jnp.sum(t, axis=-1, keepdims=True)             # (TB, 1)
        sum_tp = jnp.sum(t * p, axis=-1, keepdims=True)        # (TB, 1)
        # -sum_c t*(p - lse) == lse*sum_c(t) - sum_c(t*p)
        ce_row = lse * sum_t - sum_tp                          # (TB, 1)

        if needs_mask:
            # Last block extends past N: mask garbage rows with a select so
            # NaN/Inf in out-of-bounds data cannot propagate.
            row = (pl.program_id(0) * tb
                   + lax.broadcasted_iota(jnp.int32, ce_row.shape, 0))
            ce_row = jnp.where(row < n_valid, ce_row, 0.0)

        ce_sum = jnp.sum(ce_row)                               # scalar partial

        # Lane-dense (8, 128) output tile; the CE partial lives at [0, 0].
        sub = lax.broadcasted_iota(jnp.int32, (8, 128), 0)
        lane = lax.broadcasted_iota(jnp.int32, (8, 128), 1)
        out_ref[0] = jnp.where((sub == 0) & (lane == 0), ce_sum, 0.0)

    return kernel


def _celoss_ce_partials(pf, tf, block_rows=None):
    """pf/tf: stacked (N, C) feature matrices (native dtype, bf16 supported).

    Returns (num_blocks, 8, 128) f32 partials; CE partial sums at [:, 0, 0].
    """
    n, c = pf.shape
    vmem_cap = _vmem_capacity_bytes()

    if block_rows is None:
        tb = _choose_block_rows(n, c,
                                jnp.dtype(pf.dtype).itemsize,
                                jnp.dtype(tf.dtype).itemsize,
                                vmem_cap)
    else:
        tb = max(8, (int(block_rows) // 8) * 8)

    if tb >= n:
        tb, num_blocks, needs_mask = n, 1, False   # single full-extent block
    else:
        num_blocks = int(pl.cdiv(n, tb))
        needs_mask = (num_blocks * tb) != n

    # v7x: 64 MiB/TC -> ~48 MiB scoped limit; v5e/v6e: up to 96 MiB.
    vmem_limit = max(32 << 20, min(vmem_cap - (16 << 20), 96 << 20))

    # TODO(synk): on 1-TC chips (v5e/v6e) a resident-accumulator output with
    # "arbitrary" semantics would drop the per-block 4 KiB writebacks; kept as
    # per-block partials + "parallel" so v7x's second TensorCore gets work.
    # TODO(synk): for C << 128, pack 128//C rows per lane row in the wrapper to
    # avoid 4x lane under-utilization (irrelevant for vocab-sized C).
    return pl.pallas_call(
        _make_ce_kernel(tb, n, needs_mask),
        out_shape=jax.ShapeDtypeStruct((num_blocks, 8, 128), jnp.float32),
        grid=(num_blocks,),
        in_specs=[
            pl.BlockSpec((tb, c), lambda i: (i, 0)),     # pred-feature rows
            pl.BlockSpec((tb, c), lambda i: (i, 0)),     # target-feature rows
        ],
        out_specs=pl.BlockSpec((1, 8, 128), lambda i: (i, 0, 0)),
        compiler_params=pltpu.CompilerParams(
            dimension_semantics=("parallel",),           # shard blocks (v7x)
            vmem_limit_bytes=int(vmem_limit),
        ),
    )(pf, tf)


# --------------------------------------------------------------------------- #
# Module wrapper
# --------------------------------------------------------------------------- #
def _stack(features):
    if isinstance(features, (list, tuple)):
        if len(features) == 1:
            return features[0]
        return jnp.concatenate(features, axis=0)   # one-time (L*B, C) stack
    return features                                # already stacked: no copy


def celoss(pred, target, pred_features, target_features,
           weight_factor=0.8, block_rows=None):
    """pred, target: (B, 1). pred_features / target_features: list of (B, C)
    arrays, or a single already-stacked (L*B, C) array (skips the concat copy).
    Features may be bf16; the kernel upcasts and accumulates in f32.
    """
    pf = _stack(pred_features)
    tf = _stack(target_features)

    # Label (MSE) loss over the tiny (B, 1) predictions: plain XLA.
    d = pred.astype(jnp.float32) - target.astype(jnp.float32)
    label_loss = jnp.mean(d * d)

    partials = _celoss_ce_partials(pf, tf, block_rows)
    ce_total = jnp.sum(partials[:, 0, 0])
    # sum_i mean_b(CE_i) / L  ==  mean over all L*B rows.
    feature_mean = ce_total / pf.shape[0]

    w = float(weight_factor)
    return (1.0 - w) * label_loss + w * feature_mean


def _celoss_ref(pred, target, pred_features, target_features, weight_factor=0.8):
    """Pure-JAX reference for sanity checking."""
    label_loss = jnp.mean((pred - target) ** 2)
    feature_loss = 0.0
    for p, t in zip(pred_features, target_features):
        logsm = jax.nn.log_softmax(p.astype(jnp.float32), axis=-1)
        feature_loss = feature_loss + jnp.mean(-jnp.sum(t * logsm, axis=-1))
    num_layers = len(pred_features)
    return ((1.0 - weight_factor) * label_loss
            + weight_factor * feature_loss / num_layers)


if __name__ == "__main__":
    key = jax.random.PRNGKey(0)
    B, C, L = 10, 32, 3   # batch, classes, number of feature layers

    k = jax.random.split(key, 2 + 2 * L)
    pred = jax.random.normal(k[0], (B, 1), dtype=jnp.float32)
    target = jax.random.normal(k[1], (B, 1), dtype=jnp.float32)
    pred_features = [jax.random.normal(k[2 + i], (B, C), dtype=jnp.float32)
                     for i in range(L)]
    target_features = [jax.nn.softmax(
        jax.random.normal(k[2 + L + i], (B, C), dtype=jnp.float32), axis=-1)
        for i in range(L)]

    ref = _celoss_ref(pred, target, pred_features, target_features, 0.8)

    # Path 1: forced small blocks -> N = L*B = 30 rows, tb = 8 -> 4 blocks with
    # in-kernel tail masking of the 2 garbage rows (no jnp.pad copies).
    out = celoss(pred, target, pred_features, target_features,
                 weight_factor=0.8, block_rows=8)
    out = jax.block_until_ready(out)
    assert jnp.allclose(out, ref, rtol=2e-5, atol=2e-5), (out, ref)

    # Path 2: auto-sized tiles (>= 2 blocks for v7x) on already-stacked bf16
    # features (no concat copy, half the HBM traffic).
    pf_bf16 = jnp.concatenate(pred_features, axis=0).astype(jnp.bfloat16)
    tf_bf16 = jnp.concatenate(target_features, axis=0).astype(jnp.bfloat16)
    out_bf16 = celoss(pred, target, pf_bf16, tf_bf16, weight_factor=0.8)
    out_bf16 = jax.block_until_ready(out_bf16)
    assert jnp.allclose(out_bf16, ref, rtol=5e-2, atol=5e-2), (out_bf16, ref)

    print("KERNEL_OK")
</pallas_src>

<mosaic_0001>
module attributes {stable_mosaic.version = 11 : i64} {
  func.func @kernel(%arg0: i32, %arg1: memref<8x32xf32, #tpu.memory_space<vmem>>, %arg2: memref<8x32xf32, #tpu.memory_space<vmem>>, %arg3: memref<1x8x128xf32, #tpu.memory_space<vmem>>) attributes {dimension_semantics = [#tpu.dimension_semantics<parallel>], iteration_bounds = array<i64: 4>, scalar_prefetch = 0 : i64, scratch_operands = 0 : i64, tpu.core_type = #tpu.core_type<tc>, window_params = [{transform_indices = @transform_0, window_bounds = array<i64: 8, 32>}, {transform_indices = @transform_1, window_bounds = array<i64: 8, 32>}, {transform_indices = @transform_2, window_bounds = array<i64: 1, 8, 128>}]} {
    %c0 = arith.constant 0 : index
    %c0_0 = arith.constant 0 : index
    %0 = vector.load %arg1[%c0, %c0_0] : memref<8x32xf32, #tpu.memory_space<vmem>>, vector<8x32xf32>
    %c0_1 = arith.constant 0 : index
    %c0_2 = arith.constant 0 : index
    %1 = vector.load %arg2[%c0_1, %c0_2] : memref<8x32xf32, #tpu.memory_space<vmem>>, vector<8x32xf32>
    %cst = arith.constant dense<0xFF800000> : vector<8xf32>
    %2 = vector.multi_reduction <maximumf>, %0, %cst [1] : vector<8x32xf32> to vector<8xf32>
    %3 = vector.shape_cast %2 : vector<8xf32> to vector<8x1xf32>
    %4 = vector.broadcast %3 : vector<8x1xf32> to vector<8x32xf32>
    %5 = arith.subf %0, %4 : vector<8x32xf32>
    %6 = math.exp %5 : vector<8x32xf32>
    %cst_3 = arith.constant dense<0.000000e+00> : vector<8xf32>
    %7 = vector.multi_reduction <add>, %6, %cst_3 [1] : vector<8x32xf32> to vector<8xf32>
    %8 = vector.shape_cast %7 : vector<8xf32> to vector<8x1xf32>
    %9 = math.log %8 : vector<8x1xf32>
    %10 = arith.addf %9, %3 : vector<8x1xf32>
    %cst_4 = arith.constant dense<0.000000e+00> : vector<8xf32>
    %11 = vector.multi_reduction <add>, %1, %cst_4 [1] : vector<8x32xf32> to vector<8xf32>
    %12 = vector.shape_cast %11 : vector<8xf32> to vector<8x1xf32>
    %13 = arith.mulf %1, %0 : vector<8x32xf32>
    %cst_5 = arith.constant dense<0.000000e+00> : vector<8xf32>
    %14 = vector.multi_reduction <add>, %13, %cst_5 [1] : vector<8x32xf32> to vector<8xf32>
    %15 = vector.shape_cast %14 : vector<8xf32> to vector<8x1xf32>
    %16 = arith.mulf %10, %12 : vector<8x1xf32>
    %17 = arith.subf %16, %15 : vector<8x1xf32>
    %c8_i32 = arith.constant 8 : i32
    %18 = arith.muli %arg0, %c8_i32 : i32
    %19 = tpu.iota {dimensions = array<i32: 0>} : vector<8x1xi32>
    %20 = vector.broadcast %18 : i32 to vector<8x1xi32>
    %21 = arith.addi %20, %19 : vector<8x1xi32>
    %c30_i32 = arith.constant 30 : i32
    %22 = vector.broadcast %c30_i32 : i32 to vector<8x1xi32>
    %23 = arith.cmpi slt, %21, %22 : vector<8x1xi32>
    %cst_6 = arith.constant 0.000000e+00 : f32
    %24 = vector.broadcast %cst_6 : f32 to vector<8x1xf32>
    %25 = arith.select %23, %17, %24 : vector<8x1xi1>, vector<8x1xf32>
    %26 = vector.shape_cast %25 : vector<8x1xf32> to vector<1x8x1xf32>
    %cst_7 = arith.constant dense<0.000000e+00> : vector<1xf32>
    %27 = vector.multi_reduction <add>, %26, %cst_7 [1, 2] : vector<1x8x1xf32> to vector<1xf32>
    %28 = vector.shape_cast %27 : vector<1xf32> to vector<1x1x1xf32>
    %29 = vector.extract %28[0, 0, 0] : f32 from vector<1x1x1xf32>
    %30 = tpu.iota {dimensions = array<i32: 0>} : vector<8x128xi32>
    %31 = tpu.iota {dimensions = array<i32: 1>} : vector<8x128xi32>
    %c0_i32 = arith.constant 0 : i32
    %32 = vector.broadcast %c0_i32 : i32 to vector<8x128xi32>
    %33 = arith.cmpi eq, %30, %32 : vector<8x128xi32>
    %c0_i32_8 = arith.constant 0 : i32
    %34 = vector.broadcast %c0_i32_8 : i32 to vector<8x128xi32>
    %35 = arith.cmpi eq, %31, %34 : vector<8x128xi32>
    %36 = arith.andi %33, %35 : vector<8x128xi1>
    %cst_9 = arith.constant 0.000000e+00 : f32
    %37 = vector.broadcast %29 : f32 to vector<8x128xf32>
    %38 = vector.broadcast %cst_9 : f32 to vector<8x128xf32>
    %39 = arith.select %36, %37, %38 : vector<8x128xi1>, vector<8x128xf32>
    %c0_10 = arith.constant 0 : index
    %c0_11 = arith.constant 0 : index
    %c0_12 = arith.constant 0 : index
    %40 = vector.load %arg3[%c0_10, %c0_11, %c0_12] : memref<1x8x128xf32, #tpu.memory_space<vmem>>, vector<1x8x128xf32>
    %41 = vector.shape_cast %40 : vector<1x8x128xf32> to vector<8x128xf32>
    %42 = vector.shape_cast %39 : vector<8x128xf32> to vector<1x8x128xf32>
    tpu.vector_store %arg3[%c0_10, %c0_11, %c0_12], %42 {strides = array<i32>} : memref<1x8x128xf32, #tpu.memory_space<vmem>>, vector<1x8x128xf32>,
    return
  }
  func.func @transform_0(%arg0: i32) -> (i32, i32) {
    %c0_i32 = arith.constant 0 : i32
    %c0_i32_0 = arith.constant 0 : i32
    return %arg0, %c0_i32 : i32, i32
  }
  func.func @transform_1(%arg0: i32) -> (i32, i32) {
    %c0_i32 = arith.constant 0 : i32
    %c0_i32_0 = arith.constant 0 : i32
    return %arg0, %c0_i32 : i32, i32
  }
  func.func @transform_2(%arg0: i32) -> (i32, i32, i32) {
    %c0_i32 = arith.constant 0 : i32
    %c0_i32_0 = arith.constant 0 : i32
    %c0_i32_1 = arith.constant 0 : i32
    return %arg0, %c0_i32, %c0_i32_0 : i32, i32, i32
  }
}

</mosaic_0001>

<bundles_post_ra>
// kernel: tpu_custom_call.1
= control target key start
LH: loop header
LB: loop body
LE: loop exit
PB: predicated region body
PF: predicated region fallthrough
CT: control target
= control target key end

     0   :  { %7 = vsyncpa [#allocation3], 0  ;;  %s789_s0 = inlined_call_operand.hbm [shape: f32[30,32], index: 0, kind: input, shape index: {}]   ;;  %s790_s1 = inlined_call_operand.hbm [shape: f32[30,32], index: 1, kind: input, shape index: {}]   ;;  %s791_s2 = inlined_call_operand.hbm [shape: f32[4,8,128], index: 2, kind: output, shape index: {}]  }
   0x1   :  { %9 = vsyncpa [#allocation3 + $0x1], 0 }
   0x2   :  { %10 = vsyncpa [#allocation6], 0 }
   0x3   :  { %12 = vsyncpa [#allocation6 + $0x1], 0 }
   0x4   :  { %13 = vsyncpa [#allocation4], 0 }
   0x5   :  { %15 = vsyncpa [#allocation4 + $0x1], 0  ;;  %s576_s9 = smov 0   ;;  %s578_s10 = smov 0  }
   0x6   :  { %s580_s11 = smov 0   ;;  %s582_s12 = smov 0  }
   0x7 LB: > { %s597_s13 = sadd.s32 4294967295, %s556_s12   ;;  %s353_s14 = sadd.s32 4294967294, %s556_s12   ;;  %s556_s12 = sphi %s582_s12, %s809_s12   ;;  %s552_s11 = sphi %s580_s11, %s808_s11   ;;  %s548_s10 = sphi %s578_s10, %s807_s10   ;;  %s544_s9 = sphi %s576_s9, %s806_s9  }
   0x8   : > { %s601_s15 = sadd.s32 1, %s556_s12   ;;  %s28_s16 = sadd.s32 1, %s552_s11 }
   0x9   : > { %s25_s17 = ssub.s32 %s556_s12, %s601_s15  ;;  %p35_p0 = scmp.ne.s32.totalorder %s552_s11, %s548_s10 }
   0xa   : > { %p26_p1 = scmp.eq.s32.totalorder %s25_s17, 0  ;;  %p36_p2 = scmp.eq.s32.totalorder %s556_s12, 0 }
   0xb   : > { %p41_p3 = scmp.ne.s32.totalorder %s548_s10, %s544_s9  ;;  %p42_p4 = scmp.eq.s32.totalorder %s597_s13, 0 }
   0xc   : > { %s613_s18 = scalar_select %p26_p1, %s552_s11, %s28_s16  }
   0xd   : > { %p615_p5 = por %p36_p2, %p35_p0  ;;  %p619_p6 = por %p42_p4, %p41_p3 }
   0xe   : > { %p91_p7 = scmp.eq.s32.totalorder %s597_s13, 3  ;;  %p97_p8 = scmp.eq.s32.totalorder %s353_s14, 3 }
   0xf   : > { %s795_s20 = scalar_select %p619_p6, 1, 0 }
  0x10   : > { %p388_p9 = scmp.lt.s32.totalorder %s556_s12, 4  ;;  %p625_p10 = por %p91_p7, %p35_p0 }
  0x11   : > { %p629_p11 = por %p97_p8, %p41_p3  ;;  %s634_s23 = sand.u32 1, %s552_s11  }
  0x12   : > { %s796_s21 = scalar_select %p625_p10, 1, 0 }
  0x13   : > { %s797_s22 = scalar_select %p629_p11, 1, 0 }
  0x14   : > { %s357_s24 = sshll.u32 %s556_s12, 7  ;;  %s356_s25 = sshll.u32 %s634_s23, 3 }
  0x15   : > { %s643_s28 = scalar_lea.hbm %s789_s0, %s357_s24  ;;  %s121_s29 = scalar_lea.vmem [#allocation2], %s356_s25 }
  0x16   : > { %s128_s30 = sshll.u32 %s121_s29, 4  ;;  %p649_p12 = pnand %p388_p9, %p615_p5  ;;  %s653_s30 = int_to_ptr.vmem [resolvable:$true] %s128_s30 }
  0x17   : > { %s118_s4 = scalar_lea.sflag [#allocation3], %s634_s23  ;;  %s426_s5 = scalar_lea.hbm %s643_s28, 128 }
  0x18   : > { %p427_p1 = scmp.ne.s32.totalorder %s643_s28, %s426_s5  ;;  %p428_p2 = pneg %p649_p12 }
  0x19   : > { %s431_s8 = scalar_lea.hbm %s789_s0, 512  ;;  %p432_p5 = scmp.lt.u32.totalorder %s643_s28, %s789_s0 }
  0x1a   : > { %p429_p3 = pnand %p428_p2, %p427_p1  ;;  %p433_p7 = scmp.lt.u32.totalorder %s431_s8, %s426_s5 }
  0x1b   : > { %p435_p9 = scmp.lt.u32.totalorder %s426_s5, %s643_s28 }
  0x1c   : > { %p430_p4 = pneg %p429_p3  ;;  %p434_p8 = por %p433_p7, %p432_p5 }
  0x1e   : > { %p436_p13 = por %p435_p9, %p434_p8 }
  0x20   : > { %p437_p0 = pnand %p436_p13, %p430_p4 }
  0x22   : > { %440 = shalt.err (!%p437_p0)
}
  0x23   : > { %s441_s17 = scalar_lea.vmem %s653_s30, 128  ;;  %s558_s19 = smov [#allocation2]  }
  0x24   : > { %p442_p1 = scmp.ne.s32.totalorder %s653_s30, %s441_s17  ;;  %s446_s26 = sshll.u32 %s558_s19, 4  ;;  %s447_s26 = int_to_ptr.vmem [resolvable:$false] %s446_s26 }
  0x25   : > { %s448_s27 = scalar_lea.vmem %s447_s26, 256  ;;  %p449_p10 = scmp.lt.s32.totalorder %s653_s30, %s447_s26 }
  0x26   : > { %p444_p3 = pnand %p442_p1, %p428_p2  ;;  %p450_p5 = scmp.lt.s32.totalorder %s448_s27, %s441_s17 }
  0x28   : > { %p445_p11 = pneg %p444_p3  ;;  %p451_p7 = por %p450_p5, %p449_p10 }
  0x2a   : > { %p452_p8 = pnand %p451_p7, %p445_p11 }
  0x2c   : > { %455 = shalt.err (!%p452_p8)
}
  0x2d   : > { %380 = dma.hbm_to_vmem [thread:$0]  (!%p649_p12), %s643_s28, 128, %s653_s30, %s118_s4  }
  0x2e   : > { %p799_p13 = scmp.lt.s32.totalorder %s556_s12, 5  ;;  %p800_p0 = scmp.ge.s32.totalorder %s556_s12, 1 }
  0x2f   : > { %s696_s7 = scalar_lea.hbm %s790_s1, %s357_s24  ;;  %s139_s8 = scalar_lea.vmem [#allocation5], %s356_s25 }
  0x30   : > { %p687_p4 = pnand %p800_p0, %p799_p13  ;;  %s146_s14 = sshll.u32 %s139_s8, 4  ;;  %s147_s14 = int_to_ptr.vmem [resolvable:$true] %s146_s14 }
  0x31   : > { %s136_s28 = scalar_lea.sflag [#allocation6], %s634_s23  ;;  %s456_s30 = scalar_lea.hbm %s696_s7, 128 }
  0x32   : > { %s801_s29 = scalar_select %p687_p4, 1, 0 }
  0x33   : > { %p457_p10 = scmp.ne.s32.totalorder %s696_s7, %s456_s30  ;;  %s461_s24 = scalar_lea.hbm %s790_s1, 512 }
  0x34   : > { %p462_p1 = scmp.lt.u32.totalorder %s696_s7, %s790_s1  ;;  %p463_p3 = scmp.lt.u32.totalorder %s461_s24, %s456_s30 }
  0x35   : > { %p459_p11 = pnand %p457_p10, %p428_p2  ;;  %p465_p7 = scmp.lt.u32.totalorder %s456_s30, %s696_s7 }
  0x36   : > { %p464_p5 = por %p463_p3, %p462_p1 }
  0x37   : > { %p460_p9 = pneg %p459_p11 }
  0x38   : > { %p466_p8 = por %p465_p7, %p464_p5 }
  0x3a   : > { %p467_p13 = pnand %p466_p8, %p460_p9 }
  0x3c   : > { %470 = shalt.err (!%p467_p13)
}
  0x3d   : > { %s471_s23 = scalar_lea.vmem %s147_s14, 128  ;;  %s559_s25 = smov [#allocation5]  }
  0x3e   : > { %p472_p0 = scmp.ne.s32.totalorder %s147_s14, %s471_s23  ;;  %s476_s26 = sshll.u32 %s559_s25, 4  ;;  %s477_s26 = int_to_ptr.vmem [resolvable:$false] %s476_s26 }
  0x3f   : > { %s478_s27 = scalar_lea.vmem %s477_s26, 256  ;;  %p479_p6 = scmp.lt.s32.totalorder %s147_s14, %s477_s26 }
  0x40   : > { %p474_p10 = pnand %p472_p0, %p428_p2  ;;  %p480_p4 = scmp.lt.s32.totalorder %s478_s27, %s471_s23 }
  0x42   : > { %p475_p11 = pneg %p474_p10  ;;  %p481_p1 = por %p480_p4, %p479_p6 }
  0x44   : > { %p482_p3 = pnand %p481_p1, %p475_p11 }
  0x46   : > { %485 = shalt.err (!%p482_p3)
}
  0x47   : > { %383 = dma.hbm_to_vmem [thread:$0]  (!%p649_p12), %s696_s7, 128, %s147_s14, %s136_s28  }
  0x48   : > { %p802_p9 = scmp.ne.s32.totalorder %s801_s29, 0 }
  0x49   : > { %s723_s5 = sand.u32 (!%p802_p9), 1, %s548_s10   ;;  %p803_p6 = scmp.ne.s32.totalorder (!%p802_p9), %s795_s20, 0 }
  0x4a   : > { %155 = sbr.rel (%p802_p9) target bundleno = 627 (0x273), region = 28  ;;  %s726_s6 = sshll.u32 (!%p802_p9), %s723_s5, 3 }
  0x4b   : > { %s158_s8 = scalar_lea.sflag (!%p802_p9), [#allocation3], %s723_s5  ;;  %s161_s30 = scalar_lea.vmem (!%p802_p9), [#allocation2], %s726_s6 }
  0x51   : > { %531 = dma.done.wait (%p803_p6), %s158_s8, 128  }
  0x52   : > { %533 = vsyncadd (%p803_p6), %s158_s8, 4294967168  ;;  %s167_s3 = scalar_lea.sflag [#allocation6], %s723_s5  ;;  %s170_s29 = scalar_lea.vmem [#allocation5], %s726_s6 }
  0x53   : > { %535 = dma.done.wait (%p803_p6), %s167_s3, 128  }
  0x54   : > { %537 = vsyncadd (%p803_p6), %s167_s3, 4294967168  ;;  %vm198_vm0 = vcmask 261120   ;;  %v196_v0 = vld [vmem:[%s161_s30] sm:$0xff]  ;;  %v197_v2 = vld [vmem:[%s170_s29] sm:$0xff]  ;;  %v221_v12 = vlaneseq  ;;  %s364_s20 = sshll.u32 %s597_s13, 3  ;;  %vm227_vm2 = vcmask 7168  }
  0x55   : > { %v199_v1 = vsel %vm198_vm0, %v196_v0, -inf  ;;  %v211_v3 = vsel %vm198_vm0, %v197_v2, 0.0  ;;  %v214_v4 = vmul.f32 %v197_v2, %v196_v0  ;;  %v223_v15 = vstv %s364_s20  ;;  %s366_s7 = sshll.u32 %s597_s13, 7  ;;  %s195_s14 = scalar_lea.vmem [#allocation7], %s726_s6 }
  0x56   : > { %200 = vmax.xlane.f32.xlu0 %v199_v1  ;;  %212 = vadd.xlane.f32.xlu1 %v211_v3  ;;  %v222_v14 = vshrl.u32 %v221_v12, 7  ;;  %v239_v32 = vand.u32 127, %v221_v12  ;;  %s260_s28 = sshll.u32 %s195_s14, 4  ;;  %s746_s17 = scalar_lea.hbm %s791_s2, %s366_s7  ;;  %s748_s28 = int_to_ptr.vmem [resolvable:$true] %s260_s28 }
  0x57   : > { %v215_v5 = vsel %vm198_vm0, %v214_v4, 0.0  ;;  %s247_s19 = scalar_lea.sflag [#allocation4], %s723_s5  ;;  %s486_s23 = scalar_lea.vmem %s748_s28, 128 }
  0x58   : > { %v224_v18 = vadd.s32 %v223_v15, %v222_v14  ;;  %vm240_vm3 = vcmp.eq.s32.totalorder %v222_v14, 0  ;;  %vm241_vm4 = vcmp.eq.s32.totalorder %v239_v32, 0  ;;  %p487_p12 = scmp.ne.s32.totalorder %s748_s28, %s486_s23  ;;  %p804_p2 = scmp.ne.s32.totalorder %s796_s21, 0 }
  0x59   : > { %vm242_vm5 = vmand %vm240_vm3, %vm241_vm4  ;;  %s560_s13 = smov [#allocation7]  }
  0x5a   : > { %216 = vadd.xlane.f32.xlu1 %v215_v5  ;;  %vm225_vm1 = vcmp.lt.s32.totalorder %v224_v18, 30  ;;  %p488_p4 = pnand %p487_p12, %p804_p2  ;;  %s490_s25 = sshll.u32 %s560_s13, 4  ;;  %s491_s25 = int_to_ptr.vmem [resolvable:$false] %s490_s25 }
  0x5b   : > { %s492_s26 = scalar_lea.vmem %s491_s25, 256  ;;  %p493_p7 = scmp.lt.s32.totalorder %s748_s28, %s491_s25 }
  0x5c   : > { %p489_p5 = pneg %p488_p4  ;;  %p494_p8 = scmp.lt.s32.totalorder %s492_s26, %s486_s23 }
  0x5e   : > { %p495_p13 = por %p494_p8, %p493_p7 }
  0x60   : > { %p496_p0 = pnand %p495_p13, %p489_p5 }
  0xe3   : > { %v201_v6 = vpop.xlane.xlu0 %200  ;;  %v213_v13 = vpop.xlane.xlu1 %212 }
  0xe4   : > { %v202_v7 = vsub.f32 %v196_v0, %v201_v6 }
  0xe6   : > { %v203_v8 = vmul.f32 1.442695, %v202_v7 }
  0xe7   : > { %v217_v20 = vpop.xlane.xlu1 %216 }
  0xe8   : > { %422 = vpow2.f32 %v203_v8 }
  0xf2   : > { %v423_v9 = vpop.eup %422 }
  0xf3   : > { %v205_v10 = vsel %vm198_vm0, %v423_v9, 0.0 }
  0xf4   : > { %206 = vadd.xlane.f32.xlu0 %v205_v10 }
 0x181   : > { %v207_v11 = vpop.xlane.xlu0 %206 }
 0x182   : > { %424 = vlog2.f32 %v207_v11 }
 0x18c   : > { %v425_v16 = vpop.eup %424 }
 0x18d   : > { %v209_v17 = vmul.f32 0.6931472, %v425_v16 }
 0x18f   : > { %v210_v19 = vadd.f32 %v209_v17, %v201_v6 }
 0x191   : > { %v218_v21 = vmul.f32 %v213_v13, %v210_v19 }
 0x193   : > { %v219_v22 = vsub.f32 %v218_v21, %v217_v20 }
 0x195   : > { %v226_v23 = vsel %vm225_vm1, %v219_v22, 0.0 }
 0x196   : > { %v228_v24 = vsel %vm227_vm2, %v226_v23, 0.0 }
 0x197   : > { %229 = vadd.xlane.f32.xlu0 %v228_v24 }
 0x224   : > { %v230_v25 = vpop.xlane.xlu0 %229 }
 0x225   : > { %v231_v26 = vrot.slane %v230_v25, 4 }
 0x227   : > { %v232_v27 = vadd.f32 %v231_v26, %v230_v25 }
 0x229   : > { %v233_v28 = vrot.slane %v232_v27, 2 }
 0x22b   : > { %v234_v29 = vadd.f32 %v233_v28, %v232_v27 }
 0x22d   : > { %v235_v30 = vrot.slane %v234_v29, 1 }
 0x22f   : > { %v236_v31 = vadd.f32 %v235_v30, %v234_v29 }
 0x231   : > { %369 = vpush %v236_v31 }
 0x262   : > { %s370_s4 = spop %369 }
 0x263   : > { %v243_v33 = vstv %s370_s4 }
 0x264   : > { %v244_v34 = vsel %vm242_vm5, %v243_v33, 0.0 }
 0x265   : > { %245 = vst [vmem:[%s195_s14] sm:$0xff] %v244_v34 }
 0x266   : > { %499 = shalt.err (!%p496_p0)
}
 0x267   : > { %s500_s27 = scalar_lea.hbm %s746_s17, 128  ;;  %s504_s8 = scalar_lea.hbm %s791_s2, 512 }
 0x268   : > { %p501_p10 = scmp.ne.s32.totalorder %s746_s17, %s500_s27  ;;  %p505_p3 = scmp.lt.u32.totalorder %s746_s17, %s791_s2 }
 0x269   : > { %p506_p9 = scmp.lt.u32.totalorder %s504_s8, %s500_s27  ;;  %p508_p12 = scmp.lt.u32.totalorder %s500_s27, %s746_s17 }
 0x26a   : > { %p502_p11 = pnand %p501_p10, %p804_p2 }
 0x26b   : > { %p507_p6 = por %p506_p9, %p505_p3 }
 0x26c   : > { %p503_p1 = pneg %p502_p11 }
 0x26d   : > { %p509_p4 = por %p508_p12, %p507_p6 }
 0x26f   : > { %p510_p5 = pnand %p509_p4, %p503_p1 }
 0x271   : > { %513 = shalt.err (!%p510_p5)
}
 0x272   : > { %375 = dma.vmem_to_hbm [thread:$0]  (%p804_p2), %s748_s28, 128, %s746_s17, %s247_s19  }
 0x273 PF: > { %p389_p7 = scmp.ge.s32.totalorder %s556_s12, 2  ;;  %s272_s29 = sand.u32 1, %s544_s9  }
 0x274   : > { %p805_p8 = scmp.ne.s32.totalorder %s797_s22, 0  ;;  %s273_s20 = scalar_lea.sflag [#allocation4], %s272_s29 }
 0x276   : > { %p385_p13 = pnand %p389_p7, %p805_p8 }
 0x278   : > { %539 = dma.done.wait (!%p385_p13), %s273_s20, 128  }
 0x279   : > { %541 = vsyncadd (!%p385_p13), %s273_s20, 4294967168  ;;  %p18_p0 = scmp.ge.s32.totalorder %s601_s15, 6   ;;  %s806_s9 = smov %s548_s10 }
 0x27a   : > { %s807_s10 = smov %s552_s11  ;;  %s808_s11 = smov %s613_s18 }
 0x27b   : > { %s809_s12 = smov %s601_s15  ;;  %20 = sbr.rel (!%p18_p0) target bundleno = 7 (0x7), region = 86 }
 0x282   :  { %278 = vsyncpa [#allocation3], 1 }
 0x283   :  { %280 = vsyncpa [#allocation3 + $0x1], 1 }
 0x284   :  { %281 = vsyncpa [#allocation6], 1 }
 0x285   :  { %283 = vsyncpa [#allocation6 + $0x1], 1 }
 0x286   :  { %284 = vsyncpa [#allocation4], 1 }
 0x287   :  { %286 = vsyncpa [#allocation4 + $0x1], 1 }

</bundles_post_ra>
